<compile_context>
chip_gen: v6e
topology: v6e:2x2x1
jax: 0.10.0
libtpu: 0.0.40
codegen_flags: <defaults>
</compile_context>

<pallas_src>
import functools

import jax
import jax.numpy as jnp
from jax.experimental import pallas as pl
from jax.experimental.pallas import tpu as pltpu

_LANE = 128
_BF16_TILE_ROWS = 16   # one bf16 (sublane-packed) tile worth of rows


def _round_up(x, m):
    return ((x + m - 1) // m) * m


def _layout(dims):
    """Static padded layout shared by pack_params() and dqn_forward().

    dims = (n_obs, 64, 128, 256, 128, n_actions).
    Returns (n_obs_p, outs_p, row_offs, slab_shape, bias_shape)."""
    n_layers = len(dims) - 1
    n_obs_p = _round_up(max(dims[0], 1), _BF16_TILE_ROWS)
    outs_p = tuple(_round_up(max(d, 1), _LANE) for d in dims[1:])

    # Layers 1..N-1 are row-stacked into one slab (128-aligned row offsets);
    # layer 0's weight is a standalone tiny operand.
    row_offs = []
    acc = 0
    for li in range(1, n_layers):
        row_offs.append(acc)
        acc += outs_p[li - 1]          # padded input width of layer li
    slab_rows = max(acc, _BF16_TILE_ROWS)
    slab_cols = max(outs_p[1:]) if n_layers > 1 else _LANE
    bias_shape = (max(8, n_layers), max(outs_p))
    return n_obs_p, outs_p, tuple(row_offs), (slab_rows, slab_cols), bias_shape


def pack_params(params, n_observations):
    """Pack (W, b) pairs (W: (in, out)) into the kernel's packed operands.

    Call once per parameter update; the returned arrays are reused by every
    dqn_forward() call, so slab packing is off the per-forward hot path."""
    dims = tuple([int(n_observations)] + [int(w.shape[1]) for (w, _) in params])
    n_obs_p, outs_p, row_offs, slab_shape, bias_shape = _layout(dims)
    n_layers = len(params)

    w0, _ = params[0]
    w0_p = jnp.zeros((n_obs_p, outs_p[0]), jnp.bfloat16)
    w0_p = w0_p.at[:w0.shape[0], :w0.shape[1]].set(w0.astype(jnp.bfloat16))

    w_slab = jnp.zeros(slab_shape, jnp.bfloat16)
    for li in range(1, n_layers):
        w, _ = params[li]
        r = row_offs[li - 1]
        w_slab = w_slab.at[r:r + w.shape[0], :w.shape[1]].set(
            w.astype(jnp.bfloat16))

    b_slab = jnp.zeros(bias_shape, jnp.float32)
    for li, (_, b) in enumerate(params):
        b_slab = b_slab.at[li, :b.shape[0]].set(b.astype(jnp.float32))

    return (w0_p, w_slab, b_slab), dims


def _make_dqn_kernel(n_obs_p, outs_p, row_offs):
    """Fused-MLP kernel body for padded layer dims, unrolled at trace time."""
    n_layers = len(outs_p)

    def kernel(x_ref, w0_ref, w_ref, b_ref, o_ref):
        # Layer 0: small-K matmul against the standalone first-layer weight
        # (Mosaic pads the contraction dim to MXU tiles internally; the
        # zero-padded rows/cols keep the result exact).
        h = jnp.dot(x_ref[...], w0_ref[...],
                    preferred_element_type=jnp.float32)
        h = h + b_ref[0:1, 0:outs_p[0]]
        if n_layers > 1:
            h = jnp.maximum(h, 0.0)                       # ReLU in f32

        # Layers 1..N-1: static, 128-aligned slices of the resident slab.
        for li in range(1, n_layers):
            kin, kout = outs_p[li - 1], outs_p[li]
            r = row_offs[li - 1]
            w = w_ref[r:r + kin, 0:kout]
            h = jnp.dot(h.astype(jnp.bfloat16), w,
                        preferred_element_type=jnp.float32)
            h = h + b_ref[li:li + 1, 0:kout]
            if li < n_layers - 1:
                h = jnp.maximum(h, 0.0)

        o_ref[...] = h.astype(o_ref.dtype)                # bf16 lane-dense store

    return kernel


@functools.partial(jax.jit, static_argnames=("dims", "tb"))
def dqn_forward(x, w0_p, w_slab, b_slab, *, dims, tb=1024):
    """x: (batch, n_observations) f32. Returns (batch, n_actions) f32."""
    batch, n_obs = x.shape
    assert n_obs == dims[0]
    n_obs_p, outs_p, row_offs, _, _ = _layout(dims)
    n_layers = len(dims) - 1

    # Large tiles amortize grid-step overhead; small batches use one 128-row
    # tile. tb stays a multiple of 128 (lane-dense, 8-sublane aligned).
    tb_eff = max(_LANE, min(tb, _round_up(batch, _LANE)))
    batch_p = _round_up(batch, tb_eff)

    # Row-pad + bf16-cast the input. Feature dim padded only to one bf16 tile
    # (16), not 128 -- zero rows/cols are exact under the zero-padded weights.
    x_p = jnp.zeros((batch_p, n_obs_p), jnp.bfloat16)
    x_p = x_p.at[:batch, :n_obs].set(x.astype(jnp.bfloat16))

    kernel = _make_dqn_kernel(n_obs_p, outs_p, row_offs)

    flops = 2 * batch_p * (n_obs_p * outs_p[0]
                           + sum(outs_p[i - 1] * outs_p[i]
                                 for i in range(1, n_layers)))
    bytes_accessed = (x_p.size * 2 + w0_p.size * 2 + w_slab.size * 2
                      + b_slab.size * 4 + batch_p * outs_p[-1] * 2)

    out_p = pl.pallas_call(
        kernel,
        out_shape=jax.ShapeDtypeStruct((batch_p, outs_p[-1]), jnp.bfloat16),
        grid=(batch_p // tb_eff,),
        in_specs=[
            pl.BlockSpec((tb_eff, n_obs_p), lambda i: (i, 0)),   # batch tile
            pl.BlockSpec(w0_p.shape, lambda i: (0, 0)),          # resident
            pl.BlockSpec(w_slab.shape, lambda i: (0, 0)),        # resident
            pl.BlockSpec(b_slab.shape, lambda i: (0, 0)),        # resident
        ],
        out_specs=pl.BlockSpec((tb_eff, outs_p[-1]), lambda i: (i, 0)),
        compiler_params=pltpu.CompilerParams(
            dimension_semantics=("parallel",),
        ),
        cost_estimate=pl.CostEstimate(flops=flops, transcendentals=0,
                                      bytes_accessed=bytes_accessed),
    )(x_p, w0_p, w_slab, b_slab)

    # Strip batch / lane padding; return f32 like the PyTorch module.
    return out_p[:batch, :dims[-1]].astype(jnp.float32)


def init_params(key, n_observations, n_actions):
    """Deterministic init mimicking nn.Linear's U(-1/sqrt(fan_in), 1/sqrt(fan_in))."""
    dims = [n_observations, 64, 128, 256, 128, n_actions]
    params = []
    for i in range(len(dims) - 1):
        fan_in, fan_out = dims[i], dims[i + 1]
        key, kw, kb = jax.random.split(key, 3)
        bound = 1.0 / (fan_in ** 0.5)
        w = jax.random.uniform(kw, (fan_in, fan_out), jnp.float32, -bound, bound)
        b = jax.random.uniform(kb, (fan_out,), jnp.float32, -bound, bound)
        params.append((w, b))
    return params


def _reference_forward(x, params):
    """Same numerics as the kernel: bf16 operands, f32 accumulation, bf16 out."""
    h = x
    n = len(params)
    for i, (w, b) in enumerate(params):
        h = (h.astype(jnp.bfloat16).astype(jnp.float32)
             @ w.astype(jnp.bfloat16).astype(jnp.float32)) + b
        if i < n - 1:
            h = jnp.maximum(h, 0.0)
    return h.astype(jnp.bfloat16).astype(jnp.float32)


if __name__ == "__main__":
    key = jax.random.PRNGKey(0)
    n_observations, n_actions = 4, 2      # CartPole-ish dims
    k_x, k_p, k_x2 = jax.random.split(key, 3)

    params = init_params(k_p, n_observations, n_actions)
    packed, dims = pack_params(params, n_observations)

    # Small action-selection batch (single 128-row tile).
    x = jax.random.normal(k_x, (2, n_observations), dtype=jnp.float32)
    out = dqn_forward(x, *packed, dims=dims)
    jax.block_until_ready(out)
    ref = _reference_forward(x, params)
    assert out.shape == (2, n_actions)
    assert jnp.allclose(out, ref, atol=1e-2, rtol=1e-2), (out, ref)

    # Training-style batch: exercises the multi-tile / megacore path (grid=2).
    x2 = jax.random.normal(k_x2, (2048, n_observations), dtype=jnp.float32)
    out2 = dqn_forward(x2, *packed, dims=dims)
    jax.block_until_ready(out2)
    ref2 = _reference_forward(x2, params)
    assert out2.shape == (2048, n_actions)
    assert jnp.allclose(out2, ref2, atol=1e-2, rtol=1e-2), (
        float(jnp.max(jnp.abs(out2 - ref2))))

    print("KERNEL_OK")
</pallas_src>

<mosaic_0001>
module attributes {stable_mosaic.version = 11 : i64} {
  func.func @kernel(%arg0: i32, %arg1: memref<128x16xbf16, #tpu.memory_space<vmem>>, %arg2: memref<16x128xbf16, #tpu.memory_space<vmem>>, %arg3: memref<640x256xbf16, #tpu.memory_space<vmem>>, %arg4: memref<8x256xf32, #tpu.memory_space<vmem>>, %arg5: memref<128x128xbf16, #tpu.memory_space<vmem>>) attributes {dimension_semantics = [#tpu.dimension_semantics<parallel>], iteration_bounds = array<i64: 1>, scalar_prefetch = 0 : i64, scratch_operands = 0 : i64, tpu.core_type = #tpu.core_type<tc>, window_params = [{transform_indices = @transform_0, window_bounds = array<i64: 128, 16>}, {pipeline_mode = #tpu.pipeline_mode<synchronous>, transform_indices = @transform_1, window_bounds = array<i64: 16, 128>}, {pipeline_mode = #tpu.pipeline_mode<synchronous>, transform_indices = @transform_2, window_bounds = array<i64: 640, 256>}, {pipeline_mode = #tpu.pipeline_mode<synchronous>, transform_indices = @transform_3, window_bounds = array<i64: 8, 256>}, {transform_indices = @transform_4, window_bounds = array<i64: 128, 128>}]} {
    %c0 = arith.constant 0 : index
    %c0_0 = arith.constant 0 : index
    %0 = vector.load %arg1[%c0, %c0_0] : memref<128x16xbf16, #tpu.memory_space<vmem>>, vector<128x16xbf16>
    %c0_1 = arith.constant 0 : index
    %c0_2 = arith.constant 0 : index
    %1 = vector.load %arg2[%c0_1, %c0_2] : memref<16x128xbf16, #tpu.memory_space<vmem>>, vector<16x128xbf16>
    %cst = arith.constant dense<0.000000e+00> : vector<128x128xf32>
    %2 = tpu.matmul %0, %1, %cst {dimension_numbers = #tpu.dot_dimension_numbers<[1], [0], [0], [1], [0, 0, 1, 1], [], []>} : vector<128x16xbf16>, vector<16x128xbf16>, vector<128x128xf32> -> vector<128x128xf32>
    %c0_3 = arith.constant 0 : index
    %c0_4 = arith.constant 0 : index
    %3 = vector.load %arg4[%c0_3, %c0_4] : memref<8x256xf32, #tpu.memory_space<vmem>>, vector<1x128xf32>
    %4 = vector.broadcast %3 : vector<1x128xf32> to vector<128x128xf32>
    %5 = arith.addf %2, %4 : vector<128x128xf32>
    %cst_5 = arith.constant 0.000000e+00 : f32
    %6 = vector.broadcast %cst_5 : f32 to vector<128x128xf32>
    %7 = arith.maximumf %5, %6 : vector<128x128xf32>
    %c0_6 = arith.constant 0 : index
    %c0_7 = arith.constant 0 : index
    %8 = vector.load %arg3[%c0_6, %c0_7] : memref<640x256xbf16, #tpu.memory_space<vmem>>, vector<128x128xbf16>
    %9 = arith.truncf %7 : vector<128x128xf32> to vector<128x128xbf16>
    %cst_8 = arith.constant dense<0.000000e+00> : vector<128x128xf32>
    %10 = tpu.matmul %9, %8, %cst_8 {dimension_numbers = #tpu.dot_dimension_numbers<[1], [0], [0], [1], [0, 0, 1, 1], [], []>} : vector<128x128xbf16>, vector<128x128xbf16>, vector<128x128xf32> -> vector<128x128xf32>
    %c1 = arith.constant 1 : index
    %c0_9 = arith.constant 0 : index
    %11 = vector.load %arg4[%c1, %c0_9] : memref<8x256xf32, #tpu.memory_space<vmem>>, vector<1x128xf32>
    %12 = vector.broadcast %11 : vector<1x128xf32> to vector<128x128xf32>
    %13 = arith.addf %10, %12 : vector<128x128xf32>
    %cst_10 = arith.constant 0.000000e+00 : f32
    %14 = vector.broadcast %cst_10 : f32 to vector<128x128xf32>
    %15 = arith.maximumf %13, %14 : vector<128x128xf32>
    %c128 = arith.constant 128 : index
    %c0_11 = arith.constant 0 : index
    %16 = vector.load %arg3[%c128, %c0_11] : memref<640x256xbf16, #tpu.memory_space<vmem>>, vector<128x256xbf16>
    %17 = arith.truncf %15 : vector<128x128xf32> to vector<128x128xbf16>
    %cst_12 = arith.constant dense<0.000000e+00> : vector<128x256xf32>
    %18 = tpu.matmul %17, %16, %cst_12 {dimension_numbers = #tpu.dot_dimension_numbers<[1], [0], [0], [1], [0, 0, 1, 1], [], []>} : vector<128x128xbf16>, vector<128x256xbf16>, vector<128x256xf32> -> vector<128x256xf32>
    %c2 = arith.constant 2 : index
    %c0_13 = arith.constant 0 : index
    %19 = vector.load %arg4[%c2, %c0_13] : memref<8x256xf32, #tpu.memory_space<vmem>>, vector<1x256xf32>
    %20 = vector.broadcast %19 : vector<1x256xf32> to vector<128x256xf32>
    %21 = arith.addf %18, %20 : vector<128x256xf32>
    %cst_14 = arith.constant 0.000000e+00 : f32
    %22 = vector.broadcast %cst_14 : f32 to vector<128x256xf32>
    %23 = arith.maximumf %21, %22 : vector<128x256xf32>
    %c256 = arith.constant 256 : index
    %c0_15 = arith.constant 0 : index
    %24 = vector.load %arg3[%c256, %c0_15] : memref<640x256xbf16, #tpu.memory_space<vmem>>, vector<256x128xbf16>
    %25 = arith.truncf %23 : vector<128x256xf32> to vector<128x256xbf16>
    %cst_16 = arith.constant dense<0.000000e+00> : vector<128x128xf32>
    %26 = tpu.matmul %25, %24, %cst_16 {dimension_numbers = #tpu.dot_dimension_numbers<[1], [0], [0], [1], [0, 0, 1, 1], [], []>} : vector<128x256xbf16>, vector<256x128xbf16>, vector<128x128xf32> -> vector<128x128xf32>
    %c3 = arith.constant 3 : index
    %c0_17 = arith.constant 0 : index
    %27 = vector.load %arg4[%c3, %c0_17] : memref<8x256xf32, #tpu.memory_space<vmem>>, vector<1x128xf32>
    %28 = vector.broadcast %27 : vector<1x128xf32> to vector<128x128xf32>
    %29 = arith.addf %26, %28 : vector<128x128xf32>
    %cst_18 = arith.constant 0.000000e+00 : f32
    %30 = vector.broadcast %cst_18 : f32 to vector<128x128xf32>
    %31 = arith.maximumf %29, %30 : vector<128x128xf32>
    %c512 = arith.constant 512 : index
    %c0_19 = arith.constant 0 : index
    %32 = vector.load %arg3[%c512, %c0_19] : memref<640x256xbf16, #tpu.memory_space<vmem>>, vector<128x128xbf16>
    %33 = arith.truncf %31 : vector<128x128xf32> to vector<128x128xbf16>
    %cst_20 = arith.constant dense<0.000000e+00> : vector<128x128xf32>
    %34 = tpu.matmul %33, %32, %cst_20 {dimension_numbers = #tpu.dot_dimension_numbers<[1], [0], [0], [1], [0, 0, 1, 1], [], []>} : vector<128x128xbf16>, vector<128x128xbf16>, vector<128x128xf32> -> vector<128x128xf32>
    %c4 = arith.constant 4 : index
    %c0_21 = arith.constant 0 : index
    %35 = vector.load %arg4[%c4, %c0_21] : memref<8x256xf32, #tpu.memory_space<vmem>>, vector<1x128xf32>
    %36 = vector.broadcast %35 : vector<1x128xf32> to vector<128x128xf32>
    %37 = arith.addf %34, %36 : vector<128x128xf32>
    %38 = arith.truncf %37 : vector<128x128xf32> to vector<128x128xbf16>
    %c0_22 = arith.constant 0 : index
    %c0_23 = arith.constant 0 : index
    %39 = vector.load %arg5[%c0_22, %c0_23] : memref<128x128xbf16, #tpu.memory_space<vmem>>, vector<128x128xbf16>
    tpu.vector_store %arg5[%c0_22, %c0_23], %38 {strides = array<i32>} : memref<128x128xbf16, #tpu.memory_space<vmem>>, vector<128x128xbf16>,
    return
  }
  func.func @transform_0(%arg0: i32) -> (i32, i32) {
    %c0_i32 = arith.constant 0 : i32
    %c0_i32_0 = arith.constant 0 : i32
    return %arg0, %c0_i32 : i32, i32
  }
  func.func @transform_1(%arg0: i32) -> (i32, i32) {
    %c0_i32 = arith.constant 0 : i32
    %c0_i32_0 = arith.constant 0 : i32
    %c0_i32_1 = arith.constant 0 : i32
    return %c0_i32, %c0_i32_0 : i32, i32
  }
  func.func @transform_2(%arg0: i32) -> (i32, i32) {
    %c0_i32 = arith.constant 0 : i32
    %c0_i32_0 = arith.constant 0 : i32
    %c0_i32_1 = arith.constant 0 : i32
    return %c0_i32, %c0_i32_0 : i32, i32
  }
  func.func @transform_3(%arg0: i32) -> (i32, i32) {
    %c0_i32 = arith.constant 0 : i32
    %c0_i32_0 = arith.constant 0 : i32
    %c0_i32_1 = arith.constant 0 : i32
    return %c0_i32, %c0_i32_0 : i32, i32
  }
  func.func @transform_4(%arg0: i32) -> (i32, i32) {
    %c0_i32 = arith.constant 0 : i32
    %c0_i32_0 = arith.constant 0 : i32
    return %arg0, %c0_i32 : i32, i32
  }
}

</mosaic_0001>

<bundles_post_ra>
// kernel: dqn_forward.1
= control target key start
LH: loop header
LB: loop body
LE: loop exit
PB: predicated region body
PF: predicated region fallthrough
CT: control target
= control target key end

     0   :  { %9 = vsyncpa [#allocation3], 0  ;;  %s1619_s15 = smov [#allocation2]   ;;  %s1787_s0 = inlined_call_operand.vmem [shape: bf16[128,16], index: 0, kind: input, shape index: {}]   ;;  %s1788_s1 = inlined_call_operand.vmem [shape: bf16[16,128], index: 1, kind: input, shape index: {}]   ;;  %s1789_s2 = inlined_call_operand.hbm [shape: bf16[640,256], index: 2, kind: input, shape index: {}]   ;;  %s1790_s3 = inlined_call_operand.vmem [shape: f32[8,256], index: 3, kind: input, shape index: {}]   ;;  %s1791_s4 = inlined_call_operand.vmem [shape: bf16[128,128], index: 4, kind: output, shape index: {}]  }
   0x1   :  { %s19_s16 = sshll.u32 %s1619_s15, 4  ;;  %s20_s16 = int_to_ptr.vmem [resolvable:$true] %s19_s16 }
   0x2   :  { %s1605_s17 = scalar_lea.vmem %s20_s16, 10240  ;;  %p1610_p1 = scmp.lt.s32.totalorder %s20_s16, %s20_s16 }
   0x3   :  { %p1606_p0 = scmp.ne.s32.totalorder %s20_s16, %s1605_s17  ;;  %p1611_p2 = scmp.lt.s32.totalorder %s1605_s17, %s1605_s17 }
   0x5   :  { %p1612_p3 = por %p1611_p2, %p1610_p1 }
   0x7   :  { %p1613_p4 = pnand %p1612_p3, %p1606_p0 }
   0x9   :  { %1616 = shalt.err (!%p1613_p4)
}
   0xa   :  { %s1620_s18 = smov 128   ;;  %s1621_s19 = smov 8  }
   0xb   :  { %25 = dma.hbm_to_vmem [thread:$0]  %s1789_s2, 10240, %s20_s16, [#allocation3], %s1620_s18, %s1620_s18, %s1621_s19  }
   0xc   :  { %1617 = dma.done.wait [#allocation3], 10240  }
   0xd   :  { %1618 = vsyncadd [#allocation3], 4294957056  ;;  %v1532_v0 = vld [vmem:[%s1788_s1] sm:$0xff]   ;;  %vm97_vm0 = vcmask 130048   ;;  %v1534_v2 = vld [vmem:[%s1787_s0 + $0x8] sm:$0xff]  }
   0xe   :  { %v1533_v1 = vld [vmem:[%s1787_s0] sm:$0xff]   ;;  %1446 = vmatprep.subr.bf16.mxu0 %v1532_v0  ;;  %v1535_v3 = vld [vmem:[%s1787_s0 + $0x10] sm:$0xff]   ;;  %v1536_v4 = vld [vmem:[%s1787_s0 + $0x18] sm:$0xff]  }
   0xf   :  { %1447 = vmatpush3.bf16.msra.mxu0 %v1532_v0  ;;  %1448 = vmatprep.mubr.msk.bf16.mxu0 %vm97_vm0, %v1533_v1  ;;  %v1541_v5 = vld [vmem:[#allocation2 + $0x70] ss:$8 sps:$4 sm:$0xff]   ;;  %v1542_v6 = vld [vmem:[#allocation2 + $0x60] ss:$8 sps:$4 sm:$0xff]   ;;  %v1551_v18 = vld [vmem:[#allocation2 + $0xf4] ss:$8 sps:$4 sm:$0xff]  }
  0x10   :  { %v1537_v7 = vld [vmem:[%s1787_s0 + $0x20] sm:$0xff]   ;;  %1464 = vmatprep.subr.bf16.mxu1 %v1541_v5  ;;  %v1543_v8 = vld [vmem:[#allocation2 + $0x50] ss:$8 sps:$4 sm:$0xff]   ;;  %v1538_v10 = vld [vmem:[%s1787_s0 + $0x28] sm:$0xff]   ;;  %538 = vmatprep.subr.bf16.mxu0 %v1551_v18 }
  0x11   :  { %1465 = vmatpush3.bf16.msra.mxu1 %v1541_v5  ;;  %v1544_v9 = vld [vmem:[#allocation2 + $0x40] ss:$8 sps:$4 sm:$0xff]   ;;  %v1539_v11 = vld [vmem:[%s1787_s0 + $0x30] sm:$0xff]   ;;  %v1540_v13 = vld [vmem:[%s1787_s0 + $0x38] sm:$0xff]  }
  0x12   :  { %1449 = vmatmul.mubr.msk.bf16.vlgmr.msra.gmra.mxu0 %vm97_vm0, %v1534_v2  ;;  %1466 = vmatprep.subr.bf16.mxu1 %v1542_v6  ;;  %v1545_v12 = vld [vmem:[#allocation2 + $0x30] ss:$8 sps:$4 sm:$0xff]   ;;  %v1546_v14 = vld [vmem:[#allocation2 + $0x20] ss:$8 sps:$4 sm:$0xff]   ;;  %v1554_v19 = vld [vmem:[#allocation2 + $0xe4] ss:$8 sps:$4 sm:$0xff]  }
  0x13   :  { %1452 = vmatprep.mubr.msk.bf16.mxu0 %vm97_vm0, %v1535_v3  ;;  %v1547_v15 = vld [vmem:[#allocation2 + $0x10] ss:$8 sps:$4 sm:$0xff]   ;;  %v1548_v16 = vld [vmem:[#allocation2] ss:$8 sps:$4 sm:$0xff]   ;;  %v1557_v21 = vld [vmem:[#allocation2 + $0xd4] ss:$8 sps:$4 sm:$0xff]  }
  0x14   :  { %v1549_v17 = vld [vmem:[#allocation2 + $0xf0] ss:$8 sps:$4 sm:$0xff]   ;;  %v1552_v20 = vld [vmem:[#allocation2 + $0xe0] ss:$8 sps:$4 sm:$0xff]   ;;  %v1560_v23 = vld [vmem:[#allocation2 + $0xc4] ss:$8 sps:$4 sm:$0xff]  }
  0x15   :  { %1467 = vmatpush3.bf16.msra.mxu1 %v1542_v6  ;;  %539 = vmatpush1.bf16.msra.mxu0 %v1549_v17  ;;  %v1555_v22 = vld [vmem:[#allocation2 + $0xd0] ss:$8 sps:$4 sm:$0xff]   ;;  %v1558_v24 = vld [vmem:[#allocation2 + $0xc0] ss:$8 sps:$4 sm:$0xff]   ;;  %v1563_v25 = vld [vmem:[#allocation2 + $0xb4] ss:$8 sps:$4 sm:$0xff]  }
  0x16   :  { %1468 = vmatprep.subr.bf16.mxu1 %v1543_v8  ;;  %540 = vmatprep.subr.bf16.mxu0 %v1554_v19  ;;  %v1561_v26 = vld [vmem:[#allocation2 + $0xb0] ss:$8 sps:$4 sm:$0xff]   ;;  %v50_v29 = vld [vmem:[%s1790_s3] ss:$0 sm:$0xff] }
  0x19   :  { %1469 = vmatpush3.bf16.msra.mxu1 %v1543_v8  ;;  %541 = vmatpush1.bf16.msra.mxu0 %v1552_v20  ;;  %v1566_v20 = vld [vmem:[#allocation2 + $0xa4] ss:$8 sps:$4 sm:$0xff]  }
  0x1a   :  { %1453 = vmatmul.mubr.msk.bf16.gmra.mxu0 %vm97_vm0, %v1536_v4  ;;  %1470 = vmatprep.subr.bf16.mxu1 %v1544_v9 }
  0x1b   :  { %1456 = vmatprep.mubr.msk.bf16.mxu0 %vm97_vm0, %v1537_v7  ;;  %542 = vmatprep.subr.bf16.mxu0 %v1557_v21  ;;  %v1564_v21 = vld [vmem:[#allocation2 + $0xa0] ss:$8 sps:$4 sm:$0xff]  }
  0x1d   :  { %1471 = vmatpush3.bf16.msra.mxu1 %v1544_v9  ;;  %543 = vmatpush1.bf16.msra.mxu0 %v1555_v22  ;;  %v1569_v22 = vld [vmem:[#allocation2 + $0x94] ss:$8 sps:$4 sm:$0xff]  }
  0x1e   :  { %1472 = vmatprep.subr.bf16.mxu1 %v1545_v12  ;;  %544 = vmatprep.subr.bf16.mxu0 %v1560_v23  ;;  %v1567_v23 = vld [vmem:[#allocation2 + $0x90] ss:$8 sps:$4 sm:$0xff]  }
  0x21   :  { %1473 = vmatpush3.bf16.msra.mxu1 %v1545_v12  ;;  %545 = vmatpush1.bf16.msra.mxu0 %v1558_v24  ;;  %v1572_v24 = vld [vmem:[#allocation2 + $0x84] ss:$8 sps:$4 sm:$0xff]  }
  0x22   :  { %1457 = vmatmul.mubr.msk.bf16.gmra.mxu0 %vm97_vm0, %v1538_v10  ;;  %1474 = vmatprep.subr.bf16.mxu1 %v1546_v14 }
  0x23   :  { %1460 = vmatprep.mubr.msk.bf16.mxu0 %vm97_vm0, %v1539_v11  ;;  %546 = vmatprep.subr.bf16.mxu0 %v1563_v25  ;;  %v1570_v25 = vld [vmem:[#allocation2 + $0x80] ss:$8 sps:$4 sm:$0xff]  }
  0x25   :  { %1475 = vmatpush3.bf16.msra.mxu1 %v1546_v14  ;;  %547 = vmatpush1.bf16.msra.mxu0 %v1561_v26  ;;  %v1622_v26 = vmov 0  }
  0x26   :  { %1476 = vmatprep.subr.bf16.mxu1 %v1547_v15  ;;  %548 = vmatprep.subr.bf16.mxu0 %v1566_v20 }
  0x29   :  { %1477 = vmatpush3.bf16.msra.mxu1 %v1547_v15  ;;  %549 = vmatpush1.bf16.msra.mxu0 %v1564_v21 }
  0x2a   :  { %1461 = vmatmul.mubr.msk.bf16.gmra.mxu0 %vm97_vm0, %v1540_v13  ;;  %1478 = vmatprep.subr.bf16.mxu1 %v1548_v16 }
  0x2b   :  { %550 = vmatprep.subr.bf16.mxu0 %v1569_v22  ;;  %570 = vmatprep.mubr.bf16.mxu0 %v1622_v26 }
  0x2d   :  { %1479 = vmatpush3.bf16.msra.mxu1 %v1548_v16  ;;  %551 = vmatpush1.bf16.msra.mxu0 %v1567_v23 }
  0x2e   :  { %552 = vmatprep.subr.bf16.mxu0 %v1572_v24 }
  0x31   :  { %553 = vmatpush1.bf16.msra.mxu0 %v1570_v25 }
  0xd2   :  { %v1450_v27 = vpop.f32.mrf.mxu0 }
  0xd3   :  { %v165_v33 = vadd.f32 %v1450_v27, %v50_v29  ;;  %v1573_v27 = vld [vmem:[#allocation2 + $0x1f0] ss:$8 sps:$4 sm:$0xff]  }
  0xd4   :  { %v156_v28 = vpop.f32.mrf.mxu0  ;;  %1366 = vmatprep.subr.bf16.mxu1 %v1573_v27 }
  0xd5   :  { %v157_v31 = vadd.f32 %v156_v28, %v50_v29  ;;  %v221_v40 = vmax.f32 %v165_v33, 0.0  ;;  %v1574_v28 = vld [vmem:[#allocation2 + $0x170] ss:$8 sps:$4 sm:$0xff]   ;;  %v1579_v33 = vld [vmem:[#allocation2 + $0x1c0] ss:$8 sps:$4 sm:$0xff]  }
  0xd6   :  { %v1451_v30 = vpop.f32.mrf.mxu0 }
  0xd7   :  { %v168_v32 = vadd.f32 %v1451_v30, %v50_v29  ;;  %v219_v38 = vmax.f32 %v157_v31, 0.0  ;;  %v1576_v30 = vld [vmem:[#allocation2 + $0x160] ss:$8 sps:$4 sm:$0xff]   ;;  %v1577_v31 = vld [vmem:[#allocation2 + $0x1d0] ss:$8 sps:$4 sm:$0xff]  }
  0xd8   :  { %v159_v34 = vpop.f32.mrf.mxu0 }
  0xd9   :  { %v160_v35 = vadd.f32 %v159_v34, %v50_v29  ;;  %v222_v36 = vmax.f32 %v168_v32, 0.0  ;;  %v1578_v32 = vld [vmem:[#allocation2 + $0x150] ss:$8 sps:$4 sm:$0xff]   ;;  %v1580_v34 = vld [vmem:[#allocation2 + $0x140] ss:$8 sps:$4 sm:$0xff]  }
  0xda   :  { %v1454_v37 = vpop.f32.mrf.mxu0 }
  0xdb   :  { %v220_v39 = vmax.f32 %v160_v35, 0.0  ;;  %v181_v41 = vadd.f32 %v1454_v37, %v50_v29  ;;  %v252_v45 = vpack.c.bf16 %v222_v36, %v221_v40  ;;  %v1581_v35 = vld [vmem:[#allocation2 + $0x1b0] ss:$8 sps:$4 sm:$0xff]  }
  0xdc   :  { %v172_v42 = vpop.f32.mrf.mxu0  ;;  %v1582_v36 = vld [vmem:[#allocation2 + $0x130] ss:$8 sps:$4 sm:$0xff]  }
  0xdd   :  { %v173_v43 = vadd.f32 %v172_v42, %v50_v29  ;;  %v251_v44 = vpack.c.bf16 %v220_v39, %v219_v38  ;;  %v225_v48 = vmax.f32 %v181_v41, 0.0  ;;  %v259_v39 = vld [vmem:[%s1790_s3 + $0x1] ss:$0 sm:$0xff] }
  0xde   :  { %v1455_v46 = vpop.f32.mrf.mxu0 }
  0xdf   :  { %v184_v47 = vadd.f32 %v1455_v46, %v50_v29  ;;  %1480 = vmatprep.mubr.bf16.mxu1 %v251_v44  ;;  %v223_v50 = vmax.f32 %v173_v43, 0.0 }
  0xe0   :  { %v175_v49 = vpop.f32.mrf.mxu0  ;;  %1481 = vmatmul.mubr.bf16.vlgmr.msra.gmra.mxu1 %v252_v45 }
  0xe1   :  { %v226_v51 = vmax.f32 %v184_v47, 0.0  ;;  %v176_v52 = vadd.f32 %v175_v49, %v50_v29  ;;  %1367 = vmatpush3.bf16.msra.mxu1 %v1574_v28 }
  0xe2   :  { %v1458_v53 = vpop.f32.mrf.mxu0 }
  0xe3   :  { %v224_v54 = vmax.f32 %v176_v52, 0.0  ;;  %v254_v55 = vpack.c.bf16 %v226_v51, %v225_v48  ;;  %v197_v56 = vadd.f32 %v1458_v53, %v50_v29 }
  0xe4   :  { %v188_v57 = vpop.f32.mrf.mxu0 }
  0xe5   :  { %v253_v58 = vpack.c.bf16 %v224_v54, %v223_v50  ;;  %v189_v59 = vadd.f32 %v188_v57, %v50_v29  ;;  %v229_v62 = vmax.f32 %v197_v56, 0.0 }
  0xe6   :  { %v1459_v60 = vpop.f32.mrf.mxu0 }
  0xe7   :  { %1484 = vmatprep.mubr.bf16.mxu1 %v253_v58  ;;  %v200_v61 = vadd.f32 %v1459_v60, %v50_v29  ;;  %v227_v0 = vmax.f32 %v189_v59, 0.0 }
  0xe8   :  { %1485 = vmatmul.mubr.bf16.gmra.mxu1 %v254_v55  ;;  %v191_v63 = vpop.f32.mrf.mxu0 }
  0xe9   :  { %v230_v1 = vmax.f32 %v200_v61, 0.0  ;;  %v192_v2 = vadd.f32 %v191_v63, %v50_v29 }
  0xea   :  { %v1462_v3 = vpop.f32.mrf.mxu0 }
  0xeb   :  { %v228_v4 = vmax.f32 %v192_v2, 0.0  ;;  %v256_v5 = vpack.c.bf16 %v230_v1, %v229_v62  ;;  %v213_v6 = vadd.f32 %v1462_v3, %v50_v29 }
  0xec   :  { %v204_v7 = vpop.f32.mrf.mxu0 }
  0xed   :  { %v255_v8 = vpack.c.bf16 %v228_v4, %v227_v0  ;;  %v205_v9 = vadd.f32 %v204_v7, %v50_v29  ;;  %v233_v12 = vmax.f32 %v213_v6, 0.0 }
  0xee   :  { %v1463_v10 = vpop.f32.mrf.mxu0 }
  0xef   :  { %1488 = vmatprep.mubr.bf16.mxu1 %v255_v8  ;;  %v216_v11 = vadd.f32 %v1463_v10, %v50_v29  ;;  %v231_v14 = vmax.f32 %v205_v9, 0.0 }
  0xf0   :  { %1489 = vmatmul.mubr.bf16.gmra.mxu1 %v256_v5  ;;  %v207_v13 = vpop.f32.mrf.mxu0 }
  0xf1   :  { %v234_v15 = vmax.f32 %v216_v11, 0.0  ;;  %v208_v16 = vadd.f32 %v207_v13, %v50_v29  ;;  %v1575_v29 = vld [vmem:[#allocation2 + $0x1e0] ss:$8 sps:$4 sm:$0xff]  }
  0xf2   :  { %1368 = vmatprep.subr.bf16.mxu1 %v1575_v29 }
  0xf3   :  { %v232_v17 = vmax.f32 %v208_v16, 0.0  ;;  %v258_v18 = vpack.c.bf16 %v234_v15, %v233_v12  ;;  %1369 = vmatpush3.bf16.msra.mxu1 %v1576_v30 }
  0xf4   :  { %1370 = vmatprep.subr.bf16.mxu1 %v1577_v31  ;;  %v1583_v31 = vld [vmem:[#allocation2 + $0x1a0] ss:$8 sps:$4 sm:$0xff]  }
  0xf5   :  { %v257_v19 = vpack.c.bf16 %v232_v17, %v231_v14 }
  0xf7   :  { %1492 = vmatprep.mubr.bf16.mxu1 %v257_v19  ;;  %1371 = vmatpush3.bf16.msra.mxu1 %v1578_v32  ;;  %v1584_v32 = vld [vmem:[#allocation2 + $0x120] ss:$8 sps:$4 sm:$0xff]  }
  0xf8   :  { %1493 = vmatmul.mubr.bf16.gmra.mxu1 %v258_v18  ;;  %1372 = vmatprep.subr.bf16.mxu1 %v1579_v33  ;;  %v1585_v33 = vld [vmem:[#allocation2 + $0x190] ss:$8 sps:$4 sm:$0xff]  }
  0xfb   :  { %1373 = vmatpush3.bf16.msra.mxu1 %v1580_v34  ;;  %v1586_v34 = vld [vmem:[#allocation2 + $0x110] ss:$8 sps:$4 sm:$0xff]  }
  0xfc   :  { %1374 = vmatprep.subr.bf16.mxu1 %v1581_v35  ;;  %v1587_v35 = vld [vmem:[#allocation2 + $0x180] ss:$8 sps:$4 sm:$0xff]  }
  0xff   :  { %1375 = vmatpush3.bf16.msra.mxu1 %v1582_v36  ;;  %v1588_v36 = vld [vmem:[#allocation2 + $0x100] ss:$8 sps:$4 sm:$0xff]  }
 0x100   :  { %1376 = vmatprep.subr.bf16.mxu1 %v1583_v31 }
 0x103   :  { %1377 = vmatpush3.bf16.msra.mxu1 %v1584_v32 }
 0x104   :  { %1378 = vmatprep.subr.bf16.mxu1 %v1585_v33 }
 0x107   :  { %1379 = vmatpush3.bf16.msra.mxu1 %v1586_v34 }
 0x108   :  { %1380 = vmatprep.subr.bf16.mxu1 %v1587_v35 }
 0x10b   :  { %1381 = vmatpush3.bf16.msra.mxu1 %v1588_v36 }
 0x1a0   :  { %v1482_v37 = vpop.f32.mrf.mxu1 }
 0x1a1   :  { %v351_v51 = vadd.f32 %v1482_v37, %v259_v39  ;;  %v1589_v37 = vld [vmem:[#allocation2 + $0x270] ss:$8 sps:$4 sm:$0xff]  }
 0x1a2   :  { %v342_v38 = vpop.f32.mrf.mxu1  ;;  %1496 = vmatprep.subr.bf16.mxu0 %v1589_v37 }
 0x1a3   :  { %v343_v41 = vadd.f32 %v342_v38, %v259_v39  ;;  %v407_v54 = vmax.f32 %v351_v51, 0.0  ;;  %v1590_v38 = vld [vmem:[#allocation2 + $0x260] ss:$8 sps:$4 sm:$0xff]  }
 0x1a4   :  { %v1483_v40 = vpop.f32.mrf.mxu1 }
 0x1a5   :  { %v405_v45 = vmax.f32 %v343_v41, 0.0  ;;  %v354_v48 = vadd.f32 %v1483_v40, %v259_v39 }
 0x1a6   :  { %v345_v42 = vpop.f32.mrf.mxu1 }
 0x1a7   :  { %v346_v43 = vadd.f32 %v345_v42, %v259_v39  ;;  %v408_v52 = vmax.f32 %v354_v48, 0.0 }
 0x1a8   :  { %v1486_v44 = vpop.f32.mrf.mxu1 }
 0x1a9   :  { %v406_v46 = vmax.f32 %v346_v43, 0.0  ;;  %v438_v55 = vpack.c.bf16 %v408_v52, %v407_v54  ;;  %v367_v1 = vadd.f32 %v1486_v44, %v259_v39  ;;  %v1221_v43 = vld [vmem:[%s1790_s3 + $0x2] ss:$8 sm:$0x3] }
 0x1aa   :  { %v358_v47 = vpop.f32.mrf.mxu1 }
 0x1ab   :  { %v437_v49 = vpack.c.bf16 %v406_v46, %v405_v45  ;;  %v359_v58 = vadd.f32 %v358_v47, %v259_v39  ;;  %v411_v4 = vmax.f32 %v367_v1, 0.0 }
 0x1ac   :  { %v1487_v50 = vpop.f32.mrf.mxu1 }
 0x1ad   :  { %571 = vmatmul.mubr.bf16.vlgmr.msra.gmra.mxu0 %v437_v49  ;;  %v409_v61 = vmax.f32 %v359_v58, 0.0  ;;  %v370_v62 = vadd.f32 %v1487_v50, %v259_v39 }
 0x1ae   :  { %580 = vmatprep.mubr.bf16.mxu0 %v1622_v26  ;;  %v361_v53 = vpop.f32.mrf.mxu1  ;;  %1497 = vmatpush3.bf16.msra.mxu0 %v1589_v37 }
 0x1af   :  { %v362_v56 = vadd.f32 %v361_v53, %v259_v39  ;;  %v412_v2 = vmax.f32 %v370_v62, 0.0  ;;  %1498 = vmatprep.subr.bf16.mxu0 %v1590_v38 }
 0x1b0   :  { %v1490_v57 = vpop.f32.mrf.mxu1 }
 0x1b1   :  { %v410_v59 = vmax.f32 %v362_v56, 0.0  ;;  %v440_v5 = vpack.c.bf16 %v412_v2, %v411_v4  ;;  %v383_v12 = vadd.f32 %v1490_v57, %v259_v39 }
 0x1b2   :  { %v374_v60 = vpop.f32.mrf.mxu1  ;;  %1499 = vmatpush3.bf16.msra.mxu0 %v1590_v38 }
 0x1b3   :  { %v439_v63 = vpack.c.bf16 %v410_v59, %v409_v61  ;;  %v375_v6 = vadd.f32 %v374_v60, %v259_v39  ;;  %v415_v16 = vmax.f32 %v383_v12, 0.0 }
 0x1b4   :  { %v1491_v0 = vpop.f32.mrf.mxu1 }
 0x1b5   :  { %581 = vmatmul.mubr.bf16.gmra.mxu0 %v438_v55  ;;  %v413_v9 = vmax.f32 %v375_v6, 0.0  ;;  %v386_v13 = vadd.f32 %v1491_v0, %v259_v39 }
 0x1b6   :  { %590 = vmatprep.mubr.bf16.mxu0 %v1622_v26  ;;  %v377_v3 = vpop.f32.mrf.mxu1 }
 0x1b7   :  { %v378_v7 = vadd.f32 %v377_v3, %v259_v39  ;;  %v416_v17 = vmax.f32 %v386_v13, 0.0 }
 0x1b8   :  { %v1494_v8 = vpop.f32.mrf.mxu1 }
 0x1b9   :  { %v414_v10 = vmax.f32 %v378_v7, 0.0  ;;  %v442_v19 = vpack.c.bf16 %v416_v17, %v415_v16  ;;  %v399_v24 = vadd.f32 %v1494_v8, %v259_v39 }
 0x1ba   :  { %v390_v11 = vpop.f32.mrf.mxu1 }
 0x1bb   :  { %v441_v14 = vpack.c.bf16 %v414_v10, %v413_v9  ;;  %v391_v20 = vadd.f32 %v390_v11, %v259_v39  ;;  %v419_v28 = vmax.f32 %v399_v24, 0.0 }
 0x1bc   :  { %v1495_v15 = vpop.f32.mrf.mxu1 }
 0x1bd   :  { %591 = vmatmul.mubr.bf16.gmra.mxu0 %v439_v63  ;;  %v417_v22 = vmax.f32 %v391_v20, 0.0  ;;  %v402_v25 = vadd.f32 %v1495_v15, %v259_v39 }
 0x1be   :  { %600 = vmatprep.mubr.bf16.mxu0 %v1622_v26  ;;  %v393_v18 = vpop.f32.mrf.mxu1 }
 0x1bf   :  { %v394_v21 = vadd.f32 %v393_v18, %v259_v39  ;;  %v420_v29 = vmax.f32 %v402_v25, 0.0  ;;  %v448_v39 = vlaneseq }
 0x1c1   :  { %v418_v23 = vmax.f32 %v394_v21, 0.0  ;;  %v444_v30 = vpack.c.bf16 %v420_v29, %v419_v28  ;;  %v449_v40 = vshrl.u32 %v448_v39, 7 }
 0x1c3   :  { %v443_v27 = vpack.c.bf16 %v418_v23, %v417_v22  ;;  %v454_v41 = vsub.s32 1, %v449_v40  ;;  %v450_v42 = vsub.s32 0, %v449_v40 }
 0x1c5   :  { %601 = vmatmul.mubr.bf16.gmra.mxu0 %v440_v5  ;;  %v1703_v45 = vrot.slane %v1221_v43, %v454_v41  ;;  %v1705_v46 = vrot.slane %v1221_v43, %v450_v42 }
 0x1c6   :  { %610 = vmatprep.mubr.bf16.mxu0 %v1622_v26 }
 0x1cd   :  { %611 = vmatmul.mubr.bf16.gmra.mxu0 %v441_v14 }
 0x1ce   :  { %620 = vmatprep.mubr.bf16.mxu0 %v1622_v26 }
 0x1d5   :  { %621 = vmatmul.mubr.bf16.gmra.mxu0 %v442_v19 }
 0x1d6   :  { %630 = vmatprep.mubr.bf16.mxu0 %v1622_v26 }
 0x1dd   :  { %631 = vmatmul.mubr.bf16.gmra.mxu0 %v443_v27 }
 0x1de   :  { %640 = vmatprep.mubr.bf16.mxu0 %v1622_v26  ;;  %v1591_v26 = vld [vmem:[#allocation2 + $0x250] ss:$8 sps:$4 sm:$0xff]  }
 0x1df   :  { %1500 = vmatprep.subr.bf16.mxu0 %v1591_v26 }
 0x1e0   :  { %1501 = vmatpush3.bf16.msra.mxu0 %v1591_v26 }
 0x1e5   :  { %641 = vmatmul.mubr.bf16.gmra.mxu0 %v444_v30 }
 0x26d   :  { %v572_v44 = vpop.f32.mrf.mxu0 }
 0x26e   :  { %v573_v51 = vadd.f32 %v572_v44, %v1705_v46 }
 0x26f   :  { %v574_v47 = vpop.f32.mrf.mxu0 }
 0x270   :  { %v575_v49 = vadd.f32 %v574_v47, %v1703_v45  ;;  %v651_v58 = vmax.f32 %v573_v51, 0.0 }
 0x271   :  { %v576_v48 = vpop.f32.mrf.mxu0 }
 0x272   :  { %v577_v50 = vadd.f32 %v576_v48, %v1705_v46  ;;  %v652_v56 = vmax.f32 %v575_v49, 0.0 }
 0x273   :  { %v578_v52 = vpop.f32.mrf.mxu0 }
 0x274   :  { %v579_v53 = vadd.f32 %v578_v52, %v1703_v45  ;;  %v653_v54 = vmax.f32 %v577_v50, 0.0 }
 0x275   :  { %v582_v55 = vpop.f32.mrf.mxu0 }
 0x276   :  { %v654_v57 = vmax.f32 %v579_v53, 0.0  ;;  %v715_v61 = vpack.c.bf16 %v653_v54, %v651_v58  ;;  %v583_v1 = vadd.f32 %v582_v55, %v1705_v46 }
 0x277   :  { %v584_v59 = vpop.f32.mrf.mxu0 }
 0x278   :  { %v716_v60 = vpack.c.bf16 %v654_v57, %v652_v56  ;;  %v585_v63 = vadd.f32 %v584_v59, %v1703_v45  ;;  %v655_v8 = vmax.f32 %v583_v1, 0.0 }
 0x279   :  { %v586_v62 = vpop.f32.mrf.mxu0 }
 0x27a   :  { %v587_v0 = vadd.f32 %v586_v62, %v1705_v46  ;;  %860 = vmatprep.mubr.bf16.mxu1 %v716_v60  ;;  %v656_v6 = vmax.f32 %v585_v63, 0.0 }
 0x27b   :  { %v588_v2 = vpop.f32.mrf.mxu0  ;;  %861 = vmatmul.mubr.bf16.vlgmr.msra.gmra.mxu1 %v715_v61 }
 0x27c   :  { %v589_v3 = vadd.f32 %v588_v2, %v1703_v45  ;;  %v657_v4 = vmax.f32 %v587_v0, 0.0 }
 0x27d   :  { %v592_v5 = vpop.f32.mrf.mxu0 }
 0x27e   :  { %v658_v7 = vmax.f32 %v589_v3, 0.0  ;;  %v717_v11 = vpack.c.bf16 %v657_v4, %v655_v8  ;;  %v593_v15 = vadd.f32 %v592_v5, %v1705_v46 }
 0x27f   :  { %v594_v9 = vpop.f32.mrf.mxu0 }
 0x280   :  { %v718_v10 = vpack.c.bf16 %v658_v7, %v656_v6  ;;  %v595_v13 = vadd.f32 %v594_v9, %v1703_v45  ;;  %v659_v22 = vmax.f32 %v593_v15, 0.0 }
 0x281   :  { %v596_v12 = vpop.f32.mrf.mxu0 }
 0x282   :  { %v597_v14 = vadd.f32 %v596_v12, %v1705_v46  ;;  %868 = vmatprep.mubr.bf16.mxu1 %v718_v10  ;;  %v660_v20 = vmax.f32 %v595_v13, 0.0 }
 0x283   :  { %v598_v16 = vpop.f32.mrf.mxu0  ;;  %869 = vmatmul.mubr.bf16.gmra.mxu1 %v717_v11 }
 0x284   :  { %v599_v17 = vadd.f32 %v598_v16, %v1703_v45  ;;  %v661_v18 = vmax.f32 %v597_v14, 0.0 }
 0x285   :  { %v602_v19 = vpop.f32.mrf.mxu0 }
 0x286   :  { %v662_v21 = vmax.f32 %v599_v17, 0.0  ;;  %v719_v25 = vpack.c.bf16 %v661_v18, %v659_v22  ;;  %v603_v30 = vadd.f32 %v602_v19, %v1705_v46 }
 0x287   :  { %v604_v23 = vpop.f32.mrf.mxu0 }
 0x288   :  { %v720_v24 = vpack.c.bf16 %v662_v21, %v660_v20  ;;  %v605_v28 = vadd.f32 %v604_v23, %v1703_v45  ;;  %v663_v37 = vmax.f32 %v603_v30, 0.0 }
 0x289   :  { %v606_v27 = vpop.f32.mrf.mxu0 }
 0x28a   :  { %v607_v29 = vadd.f32 %v606_v27, %v1705_v46  ;;  %876 = vmatprep.mubr.bf16.mxu1 %v720_v24  ;;  %v664_v35 = vmax.f32 %v605_v28, 0.0 }
 0x28b   :  { %v608_v31 = vpop.f32.mrf.mxu0  ;;  %877 = vmatmul.mubr.bf16.gmra.mxu1 %v719_v25 }
 0x28c   :  { %v609_v32 = vadd.f32 %v608_v31, %v1703_v45  ;;  %v665_v33 = vmax.f32 %v607_v29, 0.0 }
 0x28d   :  { %v612_v34 = vpop.f32.mrf.mxu0 }
 0x28e   :  { %v666_v36 = vmax.f32 %v609_v32, 0.0  ;;  %v721_v39 = vpack.c.bf16 %v665_v33, %v663_v37  ;;  %v613_v43 = vadd.f32 %v612_v34, %v1705_v46  ;;  %v1592_v33 = vld [vmem:[#allocation2 + $0x240] ss:$8 sps:$4 sm:$0xff]   ;;  %v1593_v34 = vld [vmem:[#allocation2 + $0x230] ss:$8 sps:$4 sm:$0xff]  }
 0x28f   :  { %v614_v38 = vpop.f32.mrf.mxu0  ;;  %1502 = vmatprep.subr.bf16.mxu0 %v1592_v33 }
 0x290   :  { %v722_v26 = vpack.c.bf16 %v666_v36, %v664_v35  ;;  %v615_v41 = vadd.f32 %v614_v38, %v1703_v45  ;;  %v667_v52 = vmax.f32 %v613_v43, 0.0  ;;  %1503 = vmatpush3.bf16.msra.mxu0 %v1592_v33  ;;  %v1594_v35 = vld [vmem:[#allocation2 + $0x220] ss:$8 sps:$4 sm:$0xff]  }
 0x291   :  { %v616_v40 = vpop.f32.mrf.mxu0  ;;  %1504 = vmatprep.subr.bf16.mxu0 %v1593_v34 }
 0x292   :  { %v617_v42 = vadd.f32 %v616_v40, %v1705_v46  ;;  %884 = vmatprep.mubr.bf16.mxu1 %v722_v26  ;;  %v668_v50 = vmax.f32 %v615_v41, 0.0  ;;  %v1742_v26 = vld [vmem:[%s1790_s3 + $0x3] ss:$0 sm:$0xff] }
 0x293   :  { %v618_v44 = vpop.f32.mrf.mxu0  ;;  %885 = vmatmul.mubr.bf16.gmra.mxu1 %v721_v39 }
 0x294   :  { %v619_v47 = vadd.f32 %v618_v44, %v1703_v45  ;;  %v669_v48 = vmax.f32 %v617_v42, 0.0  ;;  %1505 = vmatpush3.bf16.msra.mxu0 %v1593_v34 }
 0x295   :  { %v622_v49 = vpop.f32.mrf.mxu0  ;;  %1506 = vmatprep.subr.bf16.mxu0 %v1594_v35 }
 0x296   :  { %v670_v51 = vmax.f32 %v619_v47, 0.0  ;;  %v723_v55 = vpack.c.bf16 %v669_v48, %v667_v52  ;;  %v623_v59 = vadd.f32 %v622_v49, %v1705_v46 }
 0x297   :  { %v624_v53 = vpop.f32.mrf.mxu0 }
 0x298   :  { %v724_v54 = vpack.c.bf16 %v670_v51, %v668_v50  ;;  %v625_v57 = vadd.f32 %v624_v53, %v1703_v45  ;;  %v671_v2 = vmax.f32 %v623_v59, 0.0  ;;  %1507 = vmatpush3.bf16.msra.mxu0 %v1594_v35 }
 0x299   :  { %v626_v56 = vpop.f32.mrf.mxu0 }
 0x29a   :  { %v627_v58 = vadd.f32 %v626_v56, %v1705_v46  ;;  %892 = vmatprep.mubr.bf16.mxu1 %v724_v54  ;;  %v672_v0 = vmax.f32 %v625_v57, 0.0 }
 0x29b   :  { %v628_v60 = vpop.f32.mrf.mxu0  ;;  %893 = vmatmul.mubr.bf16.gmra.mxu1 %v723_v55 }
 0x29c   :  { %v629_v61 = vadd.f32 %v628_v60, %v1703_v45  ;;  %v673_v62 = vmax.f32 %v627_v58, 0.0 }
 0x29d   :  { %v632_v63 = vpop.f32.mrf.mxu0 }
 0x29e   :  { %v674_v1 = vmax.f32 %v629_v61, 0.0  ;;  %v725_v5 = vpack.c.bf16 %v673_v62, %v671_v2  ;;  %v633_v9 = vadd.f32 %v632_v63, %v1705_v46 }
 0x29f   :  { %v634_v3 = vpop.f32.mrf.mxu0 }
 0x2a0   :  { %v726_v4 = vpack.c.bf16 %v674_v1, %v672_v0  ;;  %v635_v7 = vadd.f32 %v634_v3, %v1703_v45  ;;  %v675_v16 = vmax.f32 %v633_v9, 0.0 }
 0x2a1   :  { %v636_v6 = vpop.f32.mrf.mxu0 }
 0x2a2   :  { %v637_v8 = vadd.f32 %v636_v6, %v1705_v46  ;;  %900 = vmatprep.mubr.bf16.mxu1 %v726_v4  ;;  %v676_v14 = vmax.f32 %v635_v7, 0.0 }
 0x2a3   :  { %v638_v10 = vpop.f32.mrf.mxu0  ;;  %901 = vmatmul.mubr.bf16.gmra.mxu1 %v725_v5 }
 0x2a4   :  { %v639_v11 = vadd.f32 %v638_v10, %v1703_v45  ;;  %v677_v12 = vmax.f32 %v637_v8, 0.0 }
 0x2a5   :  { %v642_v13 = vpop.f32.mrf.mxu0 }
 0x2a6   :  { %v678_v15 = vmax.f32 %v639_v11, 0.0  ;;  %v727_v19 = vpack.c.bf16 %v677_v12, %v675_v16  ;;  %v643_v23 = vadd.f32 %v642_v13, %v1705_v46 }
 0x2a7   :  { %v644_v17 = vpop.f32.mrf.mxu0 }
 0x2a8   :  { %v728_v18 = vpack.c.bf16 %v678_v15, %v676_v14  ;;  %v645_v21 = vadd.f32 %v644_v17, %v1703_v45  ;;  %v679_v30 = vmax.f32 %v643_v23, 0.0 }
 0x2a9   :  { %v646_v20 = vpop.f32.mrf.mxu0 }
 0x2aa   :  { %v647_v22 = vadd.f32 %v646_v20, %v1705_v46  ;;  %908 = vmatprep.mubr.bf16.mxu1 %v728_v18  ;;  %v680_v28 = vmax.f32 %v645_v21, 0.0  ;;  %v1595_v46 = vld [vmem:[#allocation2 + $0x210] ss:$8 sps:$4 sm:$0xff]  }
 0x2ab   :  { %v648_v24 = vpop.f32.mrf.mxu0  ;;  %909 = vmatmul.mubr.bf16.gmra.mxu1 %v727_v19  ;;  %1508 = vmatprep.subr.bf16.mxu0 %v1595_v46 }
 0x2ac   :  { %v649_v25 = vadd.f32 %v648_v24, %v1703_v45  ;;  %v681_v27 = vmax.f32 %v647_v22, 0.0  ;;  %1509 = vmatpush3.bf16.msra.mxu0 %v1595_v46  ;;  %v1596_v45 = vld [vmem:[#allocation2 + $0x200] ss:$8 sps:$4 sm:$0xff]  }
 0x2ad   :  { %1510 = vmatprep.subr.bf16.mxu0 %v1596_v45 }
 0x2ae   :  { %v682_v29 = vmax.f32 %v649_v25, 0.0  ;;  %v729_v32 = vpack.c.bf16 %v681_v27, %v679_v30 }
 0x2b0   :  { %v730_v31 = vpack.c.bf16 %v682_v29, %v680_v28  ;;  %1511 = vmatpush3.bf16.msra.mxu0 %v1596_v45 }
 0x2b2   :  { %916 = vmatprep.mubr.bf16.mxu1 %v730_v31 }
 0x2b3   :  { %917 = vmatmul.mubr.bf16.gmra.mxu1 %v729_v32 }
 0x33b   :  { %v1382_v36 = vpop.f32.mrf.mxu1 }
 0x33d   :  { %v1383_v37 = vpop.f32.mrf.mxu1 }
 0x33e   :  { %v1384_v38 = vadd.f32 %v1383_v37, %v1382_v36 }
 0x33f   :  { %v1385_v39 = vpop.f32.mrf.mxu1 }
 0x340   :  { %v863_v41 = vadd.f32 %v1384_v38, %v1742_v26 }
 0x341   :  { %v1386_v40 = vpop.f32.mrf.mxu1 }
 0x342   :  { %v1387_v42 = vadd.f32 %v1386_v40, %v1385_v39  ;;  %v925_v48 = vmax.f32 %v863_v41, 0.0 }
 0x343   :  { %v1388_v43 = vpop.f32.mrf.mxu1 }
 0x344   :  { %v866_v44 = vadd.f32 %v1387_v42, %v1742_v26 }
 0x345   :  { %v1389_v47 = vpop.f32.mrf.mxu1 }
 0x346   :  { %v926_v49 = vmax.f32 %v866_v44, 0.0  ;;  %v1390_v50 = vadd.f32 %v1389_v47, %v1388_v43 }
 0x347   :  { %v1391_v51 = vpop.f32.mrf.mxu1 }
 0x348   :  { %v957_v52 = vpack.c.bf16 %v926_v49, %v925_v48  ;;  %v871_v54 = vadd.f32 %v1390_v50, %v1742_v26 }
 0x349   :  { %v1392_v53 = vpop.f32.mrf.mxu1 }
 0x34a   :  { %v1393_v55 = vadd.f32 %v1392_v53, %v1391_v51  ;;  %1512 = vmatprep.mubr.bf16.mxu0 %v957_v52  ;;  %v927_v59 = vmax.f32 %v871_v54, 0.0 }
 0x34b   :  { %v1394_v56 = vpop.f32.mrf.mxu1 }
 0x34c   :  { %v874_v57 = vadd.f32 %v1393_v55, %v1742_v26 }
 0x34d   :  { %v1395_v58 = vpop.f32.mrf.mxu1 }
 0x34e   :  { %v928_v60 = vmax.f32 %v874_v57, 0.0  ;;  %v1396_v61 = vadd.f32 %v1395_v58, %v1394_v56 }
 0x34f   :  { %v1397_v62 = vpop.f32.mrf.mxu1 }
 0x350   :  { %v958_v63 = vpack.c.bf16 %v928_v60, %v927_v59  ;;  %v879_v1 = vadd.f32 %v1396_v61, %v1742_v26 }
 0x351   :  { %v1398_v0 = vpop.f32.mrf.mxu1 }
 0x352   :  { %v1399_v2 = vadd.f32 %v1398_v0, %v1397_v62  ;;  %1513 = vmatmul.mubr.bf16.vlgmr.msra.gmra.mxu0 %v958_v63  ;;  %v929_v6 = vmax.f32 %v879_v1, 0.0  ;;  %v965_v0 = vld [vmem:[%s1790_s3 + $0x4] ss:$0 sm:$0xff] }
 0x353   :  { %v1400_v3 = vpop.f32.mrf.mxu1 }
 0x354   :  { %v882_v4 = vadd.f32 %v1399_v2, %v1742_v26 }
 0x355   :  { %v1401_v5 = vpop.f32.mrf.mxu1 }
 0x356   :  { %v930_v7 = vmax.f32 %v882_v4, 0.0  ;;  %v1402_v8 = vadd.f32 %v1401_v5, %v1400_v3 }
 0x357   :  { %v1403_v9 = vpop.f32.mrf.mxu1 }
 0x358   :  { %v959_v10 = vpack.c.bf16 %v930_v7, %v929_v6  ;;  %v887_v12 = vadd.f32 %v1402_v8, %v1742_v26 }
 0x359   :  { %v1404_v11 = vpop.f32.mrf.mxu1 }
 0x35a   :  { %v1405_v13 = vadd.f32 %v1404_v11, %v1403_v9  ;;  %1516 = vmatprep.mubr.bf16.mxu0 %v959_v10  ;;  %v931_v17 = vmax.f32 %v887_v12, 0.0 }
 0x35b   :  { %v1406_v14 = vpop.f32.mrf.mxu1 }
 0x35c   :  { %v890_v15 = vadd.f32 %v1405_v13, %v1742_v26 }
 0x35d   :  { %v1407_v16 = vpop.f32.mrf.mxu1 }
 0x35e   :  { %v932_v18 = vmax.f32 %v890_v15, 0.0  ;;  %v1408_v19 = vadd.f32 %v1407_v16, %v1406_v14 }
 0x35f   :  { %v1409_v20 = vpop.f32.mrf.mxu1 }
 0x360   :  { %v960_v21 = vpack.c.bf16 %v932_v18, %v931_v17  ;;  %v895_v23 = vadd.f32 %v1408_v19, %v1742_v26 }
 0x361   :  { %v1410_v22 = vpop.f32.mrf.mxu1 }
 0x362   :  { %v1411_v24 = vadd.f32 %v1410_v22, %v1409_v20  ;;  %1517 = vmatmul.mubr.bf16.gmra.mxu0 %v960_v21  ;;  %v933_v29 = vmax.f32 %v895_v23, 0.0 }
 0x363   :  { %v1412_v25 = vpop.f32.mrf.mxu1 }
 0x364   :  { %v898_v27 = vadd.f32 %v1411_v24, %v1742_v26 }
 0x365   :  { %v1413_v28 = vpop.f32.mrf.mxu1 }
 0x366   :  { %v934_v30 = vmax.f32 %v898_v27, 0.0  ;;  %v1414_v31 = vadd.f32 %v1413_v28, %v1412_v25 }
 0x367   :  { %v1415_v32 = vpop.f32.mrf.mxu1 }
 0x368   :  { %v961_v33 = vpack.c.bf16 %v934_v30, %v933_v29  ;;  %v903_v35 = vadd.f32 %v1414_v31, %v1742_v26 }
 0x369   :  { %v1416_v34 = vpop.f32.mrf.mxu1 }
 0x36a   :  { %v1417_v46 = vadd.f32 %v1416_v34, %v1415_v32  ;;  %1520 = vmatprep.mubr.bf16.mxu0 %v961_v33  ;;  %v935_v38 = vmax.f32 %v903_v35, 0.0 }
 0x36b   :  { %v1418_v45 = vpop.f32.mrf.mxu1 }
 0x36c   :  { %v906_v36 = vadd.f32 %v1417_v46, %v1742_v26 }
 0x36d   :  { %v1419_v37 = vpop.f32.mrf.mxu1 }
 0x36e   :  { %v936_v39 = vmax.f32 %v906_v36, 0.0  ;;  %v1420_v40 = vadd.f32 %v1419_v37, %v1418_v45 }
 0x36f   :  { %v1421_v41 = vpop.f32.mrf.mxu1 }
 0x370   :  { %v962_v42 = vpack.c.bf16 %v936_v39, %v935_v38  ;;  %v911_v44 = vadd.f32 %v1420_v40, %v1742_v26 }
 0x371   :  { %v1422_v43 = vpop.f32.mrf.mxu1 }
 0x372   :  { %v1423_v47 = vadd.f32 %v1422_v43, %v1421_v41  ;;  %1521 = vmatmul.mubr.bf16.gmra.mxu0 %v962_v42  ;;  %v937_v51 = vmax.f32 %v911_v44, 0.0 }
 0x373   :  { %v1424_v48 = vpop.f32.mrf.mxu1 }
 0x374   :  { %v914_v49 = vadd.f32 %v1423_v47, %v1742_v26 }
 0x375   :  { %v1425_v50 = vpop.f32.mrf.mxu1 }
 0x376   :  { %v938_v52 = vmax.f32 %v914_v49, 0.0  ;;  %v1426_v53 = vadd.f32 %v1425_v50, %v1424_v48 }
 0x377   :  { %v1427_v54 = vpop.f32.mrf.mxu1 }
 0x378   :  { %v963_v55 = vpack.c.bf16 %v938_v52, %v937_v51  ;;  %v919_v57 = vadd.f32 %v1426_v53, %v1742_v26 }
 0x379   :  { %v1428_v56 = vpop.f32.mrf.mxu1 }
 0x37a   :  { %v1429_v58 = vadd.f32 %v1428_v56, %v1427_v54  ;;  %1524 = vmatprep.mubr.bf16.mxu0 %v963_v55  ;;  %v939_v60 = vmax.f32 %v919_v57, 0.0 }
 0x37c   :  { %v922_v59 = vadd.f32 %v1429_v58, %v1742_v26 }
 0x37e   :  { %v940_v61 = vmax.f32 %v922_v59, 0.0 }
 0x380   :  { %v964_v62 = vpack.c.bf16 %v940_v61, %v939_v60 }
 0x382   :  { %1525 = vmatmul.mubr.bf16.gmra.mxu0 %v964_v62 }
 0x412   :  { %v1514_v63 = vpop.f32.mrf.mxu0 }
 0x413   :  { %v1057_v3 = vadd.f32 %v1514_v63, %v965_v0 }
 0x414   :  { %v1048_v1 = vpop.f32.mrf.mxu0 }
 0x415   :  { %v1049_v6 = vadd.f32 %v1048_v1, %v965_v0 }
 0x416   :  { %v1515_v2 = vpop.f32.mrf.mxu0 }
 0x417   :  { %v1060_v4 = vadd.f32 %v1515_v2, %v965_v0 }
 0x418   :  { %v1051_v5 = vpop.f32.mrf.mxu0 }
 0x419   :  { %v1302_v7 = vpack.c.bf16 %v1060_v4, %v1057_v3  ;;  %v1052_v8 = vadd.f32 %v1051_v5, %v965_v0 }
 0x41b   :  { %1334 = vst [vmem:[%s1791_s4 + $0x8] sm:$0xff] %v1302_v7   ;;  %v1297_v26 = vpack.c.bf16 %v1052_v8, %v1049_v6 }
 0x41d   :  { %1298 = vst [vmem:[%s1791_s4] sm:$0xff] %v1297_v26  }
 0x422   :  { %v1518_v9 = vpop.f32.mrf.mxu0 }
 0x423   :  { %v1073_v12 = vadd.f32 %v1518_v9, %v965_v0 }
 0x424   :  { %v1064_v10 = vpop.f32.mrf.mxu0 }
 0x425   :  { %v1065_v15 = vadd.f32 %v1064_v10, %v965_v0 }
 0x426   :  { %v1519_v11 = vpop.f32.mrf.mxu0 }
 0x427   :  { %v1076_v13 = vadd.f32 %v1519_v11, %v965_v0 }
 0x428   :  { %v1067_v14 = vpop.f32.mrf.mxu0 }
 0x429   :  { %v1312_v16 = vpack.c.bf16 %v1076_v13, %v1073_v12  ;;  %v1068_v17 = vadd.f32 %v1067_v14, %v965_v0 }
 0x42b   :  { %1336 = vst [vmem:[%s1791_s4 + $0x18] sm:$0xff] %v1312_v16   ;;  %v1307_v18 = vpack.c.bf16 %v1068_v17, %v1065_v15 }
 0x42d   :  { %1335 = vst [vmem:[%s1791_s4 + $0x10] sm:$0xff] %v1307_v18  }
 0x432   :  { %v1522_v19 = vpop.f32.mrf.mxu0 }
 0x433   :  { %v1089_v22 = vadd.f32 %v1522_v19, %v965_v0 }
 0x434   :  { %v1080_v20 = vpop.f32.mrf.mxu0 }
 0x435   :  { %v1081_v25 = vadd.f32 %v1080_v20, %v965_v0 }
 0x436   :  { %v1523_v21 = vpop.f32.mrf.mxu0 }
 0x437   :  { %v1092_v23 = vadd.f32 %v1523_v21, %v965_v0 }
 0x438   :  { %v1083_v24 = vpop.f32.mrf.mxu0 }
 0x439   :  { %v1322_v27 = vpack.c.bf16 %v1092_v23, %v1089_v22  ;;  %v1084_v28 = vadd.f32 %v1083_v24, %v965_v0 }
 0x43b   :  { %1338 = vst [vmem:[%s1791_s4 + $0x28] sm:$0xff] %v1322_v27   ;;  %v1317_v29 = vpack.c.bf16 %v1084_v28, %v1081_v25 }
 0x43d   :  { %1337 = vst [vmem:[%s1791_s4 + $0x20] sm:$0xff] %v1317_v29  }
 0x442   :  { %v1526_v30 = vpop.f32.mrf.mxu0 }
 0x443   :  { %v1105_v33 = vadd.f32 %v1526_v30, %v965_v0 }
 0x444   :  { %v1096_v31 = vpop.f32.mrf.mxu0 }
 0x445   :  { %v1097_v46 = vadd.f32 %v1096_v31, %v965_v0 }
 0x446   :  { %v1527_v32 = vpop.f32.mrf.mxu0 }
 0x447   :  { %v1108_v34 = vadd.f32 %v1527_v32, %v965_v0 }
 0x448   :  { %v1099_v35 = vpop.f32.mrf.mxu0 }
 0x449   :  { %v1332_v45 = vpack.c.bf16 %v1108_v34, %v1105_v33  ;;  %v1100_v36 = vadd.f32 %v1099_v35, %v965_v0 }
 0x44b   :  { %1340 = vst [vmem:[%s1791_s4 + $0x38] sm:$0xff] %v1332_v45   ;;  %v1327_v37 = vpack.c.bf16 %v1100_v36, %v1097_v46 }
 0x44d   :  { %1339 = vst [vmem:[%s1791_s4 + $0x30] sm:$0xff] %v1327_v37  }
 0x44e   :  { %1195 = vsyncpa [#allocation3], 1 }

</bundles_post_ra>
